<compile_context>
chip_gen: v6e
topology: v6e:2x2x1
jax: 0.10.0
libtpu: 0.0.40
codegen_flags: <defaults>
</compile_context>

<pallas_src>
import functools

import jax
import jax.numpy as jnp
from jax.experimental import pallas as pl
from jax.experimental.pallas import tpu as pltpu

_LANE = 128
_SUBLANE = 8
_ROW_CAP = 512            # max rows per NC block
_TILE_S_CAP = 2048        # max lanes per spatial tile
_IN_VMEM_BUDGET = 24 * 1024 * 1024   # 2 inputs x 2 pipeline bufs x f32 blocks


def _tversky_kernel(pred_ref, tgt_ref, out_ref,
                    tp_acc, p_acc, t_acc,
                    *, alpha, beta, smooth, s_total, tile_s, ragged):
    """Grid = (nc_blocks, s_blocks); axis 1 is the spatial reduction."""
    k = pl.program_id(1)

    @pl.when(k == 0)
    def _():
        tp_acc[...] = jnp.zeros_like(tp_acc)
        p_acc[...] = jnp.zeros_like(p_acc)
        t_acc[...] = jnp.zeros_like(t_acc)

    p = jax.nn.sigmoid(pred_ref[...].astype(jnp.float32))   # (tile_nc, tile_s)
    t = tgt_ref[...].astype(jnp.float32)

    if ragged:
        # Mask lanes past the true spatial extent (last block is padded with
        # unspecified values by Pallas; jnp.where keeps NaN/Inf out of sums).
        base = k * tile_s
        lane = jax.lax.broadcasted_iota(jnp.int32, p.shape, 1) + base
        valid = lane < s_total
        p = jnp.where(valid, p, 0.0)
        t = jnp.where(valid, t, 0.0)

    # Lane-partial accumulation: VPU adds only, defer the cross-lane reduce.
    n_chunks = tile_s // _LANE
    for j in range(n_chunks):
        sl = slice(j * _LANE, (j + 1) * _LANE)
        pc = p[:, sl]
        tc = t[:, sl]
        tp_acc[...] += pc * tc
        p_acc[...] += pc
        t_acc[...] += tc

    @pl.when(k == pl.num_programs(1) - 1)
    def _():
        tp = jnp.sum(tp_acc[...], axis=1, keepdims=True)    # (tile_nc, 1)
        ps = jnp.sum(p_acc[...], axis=1, keepdims=True)
        ts = jnp.sum(t_acc[...], axis=1, keepdims=True)
        fp = ps - tp
        fn = ts - tp
        out_ref[...] = (tp + smooth) / (tp + alpha * fp + beta * fn + smooth)


def _pick_tile_nc(nc):
    """Largest multiple-of-8 divisor of nc (<= _ROW_CAP); else full nc."""
    if nc % _SUBLANE != 0:
        # TODO(synk): huge nc not divisible by 8 forces a full-NC block; tile
        # the NC axis with explicit padding if that ever exceeds VMEM.
        return nc
    cand = min(nc, _ROW_CAP)
    cand -= cand % _SUBLANE
    while cand >= _SUBLANE:
        if nc % cand == 0:
            return cand
        cand -= _SUBLANE
    return _SUBLANE


def tversky_loss(pred, target, alpha=0.5, beta=0.5, smooth=0.001):
    """Pallas implementation of TverskyLoss.forward for NCHW inputs."""
    n, c, h, w = pred.shape
    nc = n * c
    s = h * w

    pred2 = pred.reshape(nc, s)
    tgt2 = target.reshape(nc, s)

    tile_nc = _pick_tile_nc(nc)

    # Spatial tile: as large as the VMEM budget allows, capped, multiple of 128.
    elem_budget = _IN_VMEM_BUDGET // (2 * 2 * 4)          # per-block elements
    max_tile_s = max(_LANE, (elem_budget // tile_nc) // _LANE * _LANE)
    max_tile_s = min(max_tile_s, _TILE_S_CAP)
    tile_s = min(max_tile_s, pl.cdiv(s, _LANE) * _LANE)
    s_blocks = pl.cdiv(s, tile_s)
    nc_blocks = nc // tile_nc
    ragged = (s % tile_s) != 0

    # Explicit scoped-VMEM limit: double-buffered inputs + scratch + headroom.
    in_block_bytes = tile_nc * tile_s * 4
    scratch_bytes = 3 * tile_nc * _LANE * 4
    vmem_needed = 2 * 2 * in_block_bytes + scratch_bytes + 2 * tile_nc * 4
    vmem_limit = min(64 * 1024 * 1024, vmem_needed + (8 << 20))

    kernel = functools.partial(
        _tversky_kernel,
        alpha=float(alpha), beta=float(beta), smooth=float(smooth),
        s_total=s, tile_s=tile_s, ragged=ragged)

    scores = pl.pallas_call(
        kernel,
        out_shape=jax.ShapeDtypeStruct((nc, 1), jnp.float32),
        grid_spec=pltpu.PrefetchScalarGridSpec(
            num_scalar_prefetch=0,
            grid=(nc_blocks, s_blocks),
            in_specs=[
                pl.BlockSpec((tile_nc, tile_s), lambda i, k: (i, k)),
                pl.BlockSpec((tile_nc, tile_s), lambda i, k: (i, k)),
            ],
            out_specs=pl.BlockSpec((tile_nc, 1), lambda i, k: (i, 0)),
            scratch_shapes=[
                pltpu.VMEM((tile_nc, _LANE), jnp.float32),  # tp partials
                pltpu.VMEM((tile_nc, _LANE), jnp.float32),  # sum(p) partials
                pltpu.VMEM((tile_nc, _LANE), jnp.float32),  # sum(t) partials
            ],
        ),
        compiler_params=pltpu.CompilerParams(
            dimension_semantics=("parallel", "arbitrary"),
            vmem_limit_bytes=vmem_limit),
    )(pred2, tgt2)

    # Final mean over all (N*C) per-row scores in plain JAX.
    return 1.0 - jnp.mean(scores)


def tversky_loss_ref(pred, target, alpha=0.5, beta=0.5, smooth=0.001):
    """Pure-JAX reference mirroring the PyTorch forward."""
    p = jax.nn.sigmoid(pred.astype(jnp.float32))
    t = target.astype(jnp.float32)
    tp = jnp.sum(p * t, axis=(2, 3))
    fp = jnp.sum(p * (1.0 - t), axis=(2, 3))
    fn = jnp.sum((1.0 - p) * t, axis=(2, 3))
    score = (tp + smooth) / (tp + alpha * fp + beta * fn + smooth)
    return 1.0 - score.mean()


if __name__ == "__main__":
    key = jax.random.PRNGKey(0)
    k1, k2, k3, k4 = jax.random.split(key, 4)

    # Small NCHW shapes: batch=2, channels=4, spatial=16x16 (defaults).
    pred = jax.random.normal(k1, (2, 4, 16, 16), dtype=jnp.float32)
    target = (jax.random.uniform(k2, (2, 4, 16, 16)) > 0.5).astype(jnp.float32)
    loss = jax.block_until_ready(tversky_loss(pred, target))
    ref = jax.block_until_ready(tversky_loss_ref(pred, target))
    assert jnp.allclose(loss, ref, rtol=1e-5, atol=1e-5), (loss, ref)

    # Ragged spatial extent (17x15 = 255 lanes) exercises the in-kernel mask
    # (no jnp.pad), plus non-default alpha/beta/smooth.
    pred2 = jax.random.normal(k3, (2, 4, 17, 15), dtype=jnp.float32)
    target2 = (jax.random.uniform(k4, (2, 4, 17, 15)) > 0.5).astype(jnp.float32)
    loss2 = jax.block_until_ready(
        tversky_loss(pred2, target2, alpha=0.3, beta=0.7, smooth=1.0))
    ref2 = jax.block_until_ready(
        tversky_loss_ref(pred2, target2, alpha=0.3, beta=0.7, smooth=1.0))
    assert jnp.allclose(loss2, ref2, rtol=1e-5, atol=1e-5), (loss2, ref2)

    print("KERNEL_OK")
</pallas_src>

<mosaic_0001>
module attributes {stable_mosaic.version = 11 : i64} {
  func.func @_tversky_kernel(%arg0: i32, %arg1: i32, %arg2: memref<8x256xf32, #tpu.memory_space<vmem>>, %arg3: memref<8x256xf32, #tpu.memory_space<vmem>>, %arg4: memref<8x1xf32, #tpu.memory_space<vmem>>, %arg5: memref<8x128xf32, #tpu.memory_space<vmem>>, %arg6: memref<8x128xf32, #tpu.memory_space<vmem>>, %arg7: memref<8x128xf32, #tpu.memory_space<vmem>>) attributes {dimension_semantics = [#tpu.dimension_semantics<parallel>, #tpu.dimension_semantics<arbitrary>], iteration_bounds = array<i64: 1, 1>, scalar_prefetch = 0 : i64, scratch_operands = 3 : i64, tpu.core_type = #tpu.core_type<tc>, window_params = [{transform_indices = @transform_0, window_bounds = array<i64: 8, 256>}, {transform_indices = @transform_1, window_bounds = array<i64: 8, 256>}, {transform_indices = @transform_2, window_bounds = array<i64: 8, 1>}]} {
    %c0_i32 = arith.constant 0 : i32
    %0 = arith.cmpi eq, %arg1, %c0_i32 : i32
    %1 = arith.extui %0 : i1 to i32
    %c0_i32_0 = arith.constant 0 : i32
    %2 = arith.cmpi ne, %1, %c0_i32_0 : i32
    scf.if %2 {
      %cst_30 = arith.constant 0.000000e+00 : f32
      %37 = vector.broadcast %cst_30 : f32 to vector<8x128xf32>
      %c0_31 = arith.constant 0 : index
      %c0_32 = arith.constant 0 : index
      %38 = vector.load %arg5[%c0_31, %c0_32] : memref<8x128xf32, #tpu.memory_space<vmem>>, vector<8x128xf32>
      tpu.vector_store %arg5[%c0_31, %c0_32], %37 {strides = array<i32>} : memref<8x128xf32, #tpu.memory_space<vmem>>, vector<8x128xf32>,
      %cst_33 = arith.constant 0.000000e+00 : f32
      %39 = vector.broadcast %cst_33 : f32 to vector<8x128xf32>
      %c0_34 = arith.constant 0 : index
      %c0_35 = arith.constant 0 : index
      %40 = vector.load %arg6[%c0_34, %c0_35] : memref<8x128xf32, #tpu.memory_space<vmem>>, vector<8x128xf32>
      tpu.vector_store %arg6[%c0_34, %c0_35], %39 {strides = array<i32>} : memref<8x128xf32, #tpu.memory_space<vmem>>, vector<8x128xf32>,
      %cst_36 = arith.constant 0.000000e+00 : f32
      %41 = vector.broadcast %cst_36 : f32 to vector<8x128xf32>
      %c0_37 = arith.constant 0 : index
      %c0_38 = arith.constant 0 : index
      %42 = vector.load %arg7[%c0_37, %c0_38] : memref<8x128xf32, #tpu.memory_space<vmem>>, vector<8x128xf32>
      tpu.vector_store %arg7[%c0_37, %c0_38], %41 {strides = array<i32>} : memref<8x128xf32, #tpu.memory_space<vmem>>, vector<8x128xf32>,
    } else {
    }
    %c0 = arith.constant 0 : index
    %c0_1 = arith.constant 0 : index
    %3 = vector.load %arg2[%c0, %c0_1] : memref<8x256xf32, #tpu.memory_space<vmem>>, vector<8x256xf32>
    %4 = arith.negf %3 : vector<8x256xf32>
    %5 = math.exp %4 : vector<8x256xf32>
    %cst = arith.constant 1.000000e+00 : f32
    %6 = vector.broadcast %cst : f32 to vector<8x256xf32>
    %7 = arith.addf %6, %5 : vector<8x256xf32>
    %8 = arith.divf %6, %7 : vector<8x256xf32>
    %c0_2 = arith.constant 0 : index
    %c0_3 = arith.constant 0 : index
    %9 = vector.load %arg3[%c0_2, %c0_3] : memref<8x256xf32, #tpu.memory_space<vmem>>, vector<8x256xf32>
    %10 = vector.extract_strided_slice %8 {offsets = [0, 0], sizes = [8, 128], strides = [1, 1]} : vector<8x256xf32> to vector<8x128xf32>
    %11 = vector.extract_strided_slice %9 {offsets = [0, 0], sizes = [8, 128], strides = [1, 1]} : vector<8x256xf32> to vector<8x128xf32>
    %c0_4 = arith.constant 0 : index
    %c0_5 = arith.constant 0 : index
    %12 = vector.load %arg5[%c0_4, %c0_5] : memref<8x128xf32, #tpu.memory_space<vmem>>, vector<8x128xf32>
    %13 = arith.mulf %10, %11 : vector<8x128xf32>
    %14 = arith.addf %12, %13 : vector<8x128xf32>
    %c0_6 = arith.constant 0 : index
    %c0_7 = arith.constant 0 : index
    %15 = vector.load %arg5[%c0_6, %c0_7] : memref<8x128xf32, #tpu.memory_space<vmem>>, vector<8x128xf32>
    tpu.vector_store %arg5[%c0_6, %c0_7], %14 {strides = array<i32>} : memref<8x128xf32, #tpu.memory_space<vmem>>, vector<8x128xf32>,
    %c0_8 = arith.constant 0 : index
    %c0_9 = arith.constant 0 : index
    %16 = vector.load %arg6[%c0_8, %c0_9] : memref<8x128xf32, #tpu.memory_space<vmem>>, vector<8x128xf32>
    %17 = arith.addf %16, %10 : vector<8x128xf32>
    %c0_10 = arith.constant 0 : index
    %c0_11 = arith.constant 0 : index
    %18 = vector.load %arg6[%c0_10, %c0_11] : memref<8x128xf32, #tpu.memory_space<vmem>>, vector<8x128xf32>
    tpu.vector_store %arg6[%c0_10, %c0_11], %17 {strides = array<i32>} : memref<8x128xf32, #tpu.memory_space<vmem>>, vector<8x128xf32>,
    %c0_12 = arith.constant 0 : index
    %c0_13 = arith.constant 0 : index
    %19 = vector.load %arg7[%c0_12, %c0_13] : memref<8x128xf32, #tpu.memory_space<vmem>>, vector<8x128xf32>
    %20 = arith.addf %19, %11 : vector<8x128xf32>
    %c0_14 = arith.constant 0 : index
    %c0_15 = arith.constant 0 : index
    %21 = vector.load %arg7[%c0_14, %c0_15] : memref<8x128xf32, #tpu.memory_space<vmem>>, vector<8x128xf32>
    tpu.vector_store %arg7[%c0_14, %c0_15], %20 {strides = array<i32>} : memref<8x128xf32, #tpu.memory_space<vmem>>, vector<8x128xf32>,
    %22 = vector.extract_strided_slice %8 {offsets = [0, 128], sizes = [8, 128], strides = [1, 1]} : vector<8x256xf32> to vector<8x128xf32>
    %23 = vector.extract_strided_slice %9 {offsets = [0, 128], sizes = [8, 128], strides = [1, 1]} : vector<8x256xf32> to vector<8x128xf32>
    %c0_16 = arith.constant 0 : index
    %c0_17 = arith.constant 0 : index
    %24 = vector.load %arg5[%c0_16, %c0_17] : memref<8x128xf32, #tpu.memory_space<vmem>>, vector<8x128xf32>
    %25 = arith.mulf %22, %23 : vector<8x128xf32>
    %26 = arith.addf %24, %25 : vector<8x128xf32>
    %c0_18 = arith.constant 0 : index
    %c0_19 = arith.constant 0 : index
    %27 = vector.load %arg5[%c0_18, %c0_19] : memref<8x128xf32, #tpu.memory_space<vmem>>, vector<8x128xf32>
    tpu.vector_store %arg5[%c0_18, %c0_19], %26 {strides = array<i32>} : memref<8x128xf32, #tpu.memory_space<vmem>>, vector<8x128xf32>,
    %c0_20 = arith.constant 0 : index
    %c0_21 = arith.constant 0 : index
    %28 = vector.load %arg6[%c0_20, %c0_21] : memref<8x128xf32, #tpu.memory_space<vmem>>, vector<8x128xf32>
    %29 = arith.addf %28, %22 : vector<8x128xf32>
    %c0_22 = arith.constant 0 : index
    %c0_23 = arith.constant 0 : index
    %30 = vector.load %arg6[%c0_22, %c0_23] : memref<8x128xf32, #tpu.memory_space<vmem>>, vector<8x128xf32>
    tpu.vector_store %arg6[%c0_22, %c0_23], %29 {strides = array<i32>} : memref<8x128xf32, #tpu.memory_space<vmem>>, vector<8x128xf32>,
    %c0_24 = arith.constant 0 : index
    %c0_25 = arith.constant 0 : index
    %31 = vector.load %arg7[%c0_24, %c0_25] : memref<8x128xf32, #tpu.memory_space<vmem>>, vector<8x128xf32>
    %32 = arith.addf %31, %23 : vector<8x128xf32>
    %c0_26 = arith.constant 0 : index
    %c0_27 = arith.constant 0 : index
    %33 = vector.load %arg7[%c0_26, %c0_27] : memref<8x128xf32, #tpu.memory_space<vmem>>, vector<8x128xf32>
    tpu.vector_store %arg7[%c0_26, %c0_27], %32 {strides = array<i32>} : memref<8x128xf32, #tpu.memory_space<vmem>>, vector<8x128xf32>,
    %c0_i32_28 = arith.constant 0 : i32
    %34 = arith.cmpi eq, %arg1, %c0_i32_28 : i32
    %35 = arith.extui %34 : i1 to i32
    %c0_i32_29 = arith.constant 0 : i32
    %36 = arith.cmpi ne, %35, %c0_i32_29 : i32
    scf.if %36 {
      %c0_30 = arith.constant 0 : index
      %c0_31 = arith.constant 0 : index
      %37 = vector.load %arg5[%c0_30, %c0_31] : memref<8x128xf32, #tpu.memory_space<vmem>>, vector<8x128xf32>
      %cst_32 = arith.constant dense<0.000000e+00> : vector<8xf32>
      %38 = vector.multi_reduction <add>, %37, %cst_32 [1] : vector<8x128xf32> to vector<8xf32>
      %39 = vector.shape_cast %38 : vector<8xf32> to vector<8x1xf32>
      %c0_33 = arith.constant 0 : index
      %c0_34 = arith.constant 0 : index
      %40 = vector.load %arg6[%c0_33, %c0_34] : memref<8x128xf32, #tpu.memory_space<vmem>>, vector<8x128xf32>
      %cst_35 = arith.constant dense<0.000000e+00> : vector<8xf32>
      %41 = vector.multi_reduction <add>, %40, %cst_35 [1] : vector<8x128xf32> to vector<8xf32>
      %42 = vector.shape_cast %41 : vector<8xf32> to vector<8x1xf32>
      %c0_36 = arith.constant 0 : index
      %c0_37 = arith.constant 0 : index
      %43 = vector.load %arg7[%c0_36, %c0_37] : memref<8x128xf32, #tpu.memory_space<vmem>>, vector<8x128xf32>
      %cst_38 = arith.constant dense<0.000000e+00> : vector<8xf32>
      %44 = vector.multi_reduction <add>, %43, %cst_38 [1] : vector<8x128xf32> to vector<8xf32>
      %45 = vector.shape_cast %44 : vector<8xf32> to vector<8x1xf32>
      %46 = arith.subf %42, %39 : vector<8x1xf32>
      %47 = arith.subf %45, %39 : vector<8x1xf32>
      %cst_39 = arith.constant 1.000000e-03 : f32
      %48 = vector.broadcast %cst_39 : f32 to vector<8x1xf32>
      %49 = arith.addf %39, %48 : vector<8x1xf32>
      %cst_40 = arith.constant 5.000000e-01 : f32
      %50 = vector.broadcast %cst_40 : f32 to vector<8x1xf32>
      %51 = arith.mulf %50, %46 : vector<8x1xf32>
      %52 = arith.addf %39, %51 : vector<8x1xf32>
      %cst_41 = arith.constant 5.000000e-01 : f32
      %53 = vector.broadcast %cst_41 : f32 to vector<8x1xf32>
      %54 = arith.mulf %53, %47 : vector<8x1xf32>
      %55 = arith.addf %52, %54 : vector<8x1xf32>
      %cst_42 = arith.constant 1.000000e-03 : f32
      %56 = vector.broadcast %cst_42 : f32 to vector<8x1xf32>
      %57 = arith.addf %55, %56 : vector<8x1xf32>
      %58 = arith.divf %49, %57 : vector<8x1xf32>
      %c0_43 = arith.constant 0 : index
      %c0_44 = arith.constant 0 : index
      %59 = vector.load %arg4[%c0_43, %c0_44] : memref<8x1xf32, #tpu.memory_space<vmem>>, vector<8x1xf32>
      tpu.vector_store %arg4[%c0_43, %c0_44], %58 {strides = array<i32>} : memref<8x1xf32, #tpu.memory_space<vmem>>, vector<8x1xf32>,
    } else {
    }
    return
  }
  func.func @transform_0(%arg0: i32, %arg1: i32) -> (i32, i32) {
    %c0_i32 = arith.constant 0 : i32
    return %arg0, %arg1 : i32, i32
  }
  func.func @transform_1(%arg0: i32, %arg1: i32) -> (i32, i32) {
    %c0_i32 = arith.constant 0 : i32
    return %arg0, %arg1 : i32, i32
  }
  func.func @transform_2(%arg0: i32, %arg1: i32) -> (i32, i32) {
    %c0_i32 = arith.constant 0 : i32
    %c0_i32_0 = arith.constant 0 : i32
    return %arg0, %c0_i32 : i32, i32
  }
}

</mosaic_0001>

<bundles_post_ra>
// kernel: tpu_custom_call.1
= control target key start
LH: loop header
LB: loop body
LE: loop exit
PB: predicated region body
PF: predicated region fallthrough
CT: control target
= control target key end

     0   :  { %7 = vsyncpa [#allocation6], 0  ;;  %s192_s0 = inlined_call_operand.hbm [shape: f32[8,256], index: 0, kind: input, shape index: {}]   ;;  %s193_s1 = inlined_call_operand.hbm [shape: f32[8,256], index: 1, kind: input, shape index: {}]   ;;  %s194_s2 = inlined_call_operand.vmem [shape: f32[8,1], index: 2, kind: output, shape index: {}]  }
   0x1   :  { %8 = vsyncpa [#allocation8], 0  ;;  %s166_s9 = smov [#allocation5]   ;;  %s167_s11 = smov [#allocation7]  }
   0x2   :  { %s15_s10 = sshll.u32 %s166_s9, 4  ;;  %s25_s12 = sshll.u32 %s167_s11, 4  ;;  %s16_s10 = int_to_ptr.vmem [resolvable:$true] %s15_s10  ;;  %s26_s12 = int_to_ptr.vmem [resolvable:$true] %s25_s12 }
   0x3   :  { %s130_s13 = scalar_lea.vmem %s16_s10, 256  ;;  %p135_p1 = scmp.lt.s32.totalorder %s16_s10, %s16_s10 }
   0x4   :  { %p131_p0 = scmp.ne.s32.totalorder %s16_s10, %s130_s13  ;;  %p136_p2 = scmp.lt.s32.totalorder %s130_s13, %s130_s13 }
   0x6   :  { %p137_p3 = por %p136_p2, %p135_p1 }
   0x8   :  { %p138_p4 = pnand %p137_p3, %p131_p0 }
   0xa   :  { %141 = shalt.err (!%p138_p4)
}
   0xb   :  { %18 = dma.hbm_to_vmem [thread:$0]  %s192_s0, 256, %s16_s10, [#allocation6]  }
   0xc   :  { %s150_s16 = scalar_lea.vmem %s26_s12, 256  ;;  %p155_p6 = scmp.lt.s32.totalorder %s26_s12, %s26_s12 }
   0xd   :  { %p151_p5 = scmp.ne.s32.totalorder %s26_s12, %s150_s16  ;;  %p156_p7 = scmp.lt.s32.totalorder %s150_s16, %s150_s16 }
   0xf   :  { %p157_p8 = por %p156_p7, %p155_p6 }
  0x11   :  { %p158_p9 = pnand %p157_p8, %p151_p5 }
  0x13   :  { %161 = shalt.err (!%p158_p9)
}
  0x14   :  { %28 = dma.hbm_to_vmem [thread:$0]  %s193_s1, 256, %s26_s12, [#allocation8]  }
  0x15   :  { %162 = dma.done.wait [#allocation6], 256  }
  0x16   :  { %163 = vsyncadd [#allocation6], 4294967040 }
  0x17   :  { %164 = dma.done.wait [#allocation8], 256  }
  0x18   :  { %165 = vsyncadd [#allocation8], 4294967040  ;;  %v56_v0 = vld [vmem:[#allocation7] sm:$0xff]  ;;  %v57_v1 = vld [vmem:[#allocation7 + $0x8] sm:$0xff]  ;;  %vm100_vm0 = vcmask 7168  }
  0x19   :  { %v42_v2 = vld [vmem:[#allocation5] sm:$0xff]  ;;  %v76_v3 = vadd.f32 %v57_v1, %v56_v0  ;;  %v43_v4 = vld [vmem:[#allocation5 + $0x8] sm:$0xff] }
  0x1a   :  { %v108_v5 = vmul.f32 -1.442695, %v42_v2  ;;  %v109_v6 = vmul.f32 -1.442695, %v43_v4 }
  0x1b   :  { %88 = vadd.xlane.f32.xlu1 %v76_v3 }
  0x1c   :  { %112 = vpow2.f32 %v108_v5 }
  0x1d   :  { %114 = vpow2.f32 %v109_v6 }
  0x29   :  { %v113_v7 = vpop.eup %112 }
  0x2a   :  { %v115_v8 = vpop.eup %114  ;;  %v50_v9 = vadd.f32 1.0, %v113_v7 }
  0x2b   :  { %v51_v10 = vadd.f32 1.0, %v115_v8 }
  0x2c   :  { %116 = vrcp.f32 %v50_v9 }
  0x2d   :  { %118 = vrcp.f32 %v51_v10 }
  0x39   :  { %v117_v11 = vpop.eup %116 }
  0x3a   :  { %v119_v12 = vpop.eup %118  ;;  %v59_v13 = vmul.f32 %v117_v11, %v56_v0 }
  0x3b   :  { %v69_v14 = vmul.f32 %v119_v12, %v57_v1  ;;  %v73_v16 = vadd.f32 %v119_v12, %v117_v11 }
  0x3d   :  { %v70_v15 = vadd.f32 %v69_v14, %v59_v13 }
  0x3f   :  { %82 = vadd.xlane.f32.xlu0 %v70_v15 }
  0x43   :  { %85 = vadd.xlane.f32.xlu0 %v73_v16 }
  0xa4   :  { %v89_v18 = vpop.xlane.xlu1 %88 }
  0xc8   :  { %v83_v17 = vpop.xlane.xlu0 %82 }
  0xc9   :  { %v91_v20 = vsub.f32 %v89_v18, %v83_v17  ;;  %v92_v27 = vadd.f32 0.001, %v83_v17 }
  0xcb   :  { %v95_v23 = vmul.f32 0.5, %v91_v20 }
  0xcc   :  { %v86_v19 = vpop.xlane.xlu0 %85 }
  0xcd   :  { %v90_v21 = vsub.f32 %v86_v19, %v83_v17 }
  0xcf   :  { %v93_v22 = vmul.f32 0.5, %v90_v21 }
  0xd1   :  { %v94_v24 = vadd.f32 %v93_v22, %v83_v17 }
  0xd3   :  { %v96_v25 = vadd.f32 %v95_v23, %v94_v24 }
  0xd5   :  { %v97_v26 = vadd.f32 0.001, %v96_v25 }
  0xd7   :  { %120 = vrcp.f32 %v97_v26 }
  0xe4   :  { %v121_v28 = vpop.eup %120 }
  0xe5   :  { %v99_v29 = vmul.f32 %v121_v28, %v92_v27 }
  0xe7   :  { %101 = vst.msk [vmem:[%s194_s2] sm:$0xff] %vm100_vm0, %v99_v29 }
  0xe8   :  { %106 = vsyncpa [#allocation6], 1 }
  0xe9   :  { %107 = vsyncpa [#allocation8], 1 }

</bundles_post_ra>
